<compile_context>
chip_gen: v5e
topology: v5e:2x2
jax: 0.10.0
libtpu: 0.0.40
codegen_flags: <defaults>
</compile_context>

<pallas_src>
import jax
import jax.numpy as jnp
from jax.experimental import pallas as pl
from jax.experimental.pallas import tpu as pltpu


LANE = 128


def _round_up(n, m):
    return ((n + m - 1) // m) * m


def critic_kernel(x_ref, w1t_ref, b1_ref, w2t_ref, b2_ref, w3_ref, b3_ref, o_ref):
    """One batch tile of the Critic MLP, computed feature-major (batch on lanes).

    x_ref   : (TB, S)   f32   batch tile (pipelined / double-buffered)
    w1t_ref : (HP, S)   bf16  layer-1 weight, (out, in)
    b1_ref  : (HP, 1)   f32
    w2t_ref : (HP, HP)  bf16  layer-2 weight, (out, in)
    b2_ref  : (HP, 1)   f32
    w3_ref  : (1, HP)   bf16  output weight as a row
    b3_ref  : (1, 1)    f32
    o_ref   : (1, TB)   f32   lane-dense output row (batch on lanes)
    """
    # In-kernel bf16 cast (free VPU work, avoids a wrapper HBM pass) and one small
    # transpose of the (TB, S) tile -> feature-major for the whole MLP.  Transposing
    # x here is ~8x fewer bytes than transposing the (TB, HP) h1/h2 activations.
    xt = x_ref[...].T.astype(jnp.bfloat16)                                  # (S, TB)

    # Layer 1: (HP, S) @ (S, TB) -> (HP, TB), f32 accumulate on the MXU.
    h1 = jnp.dot(w1t_ref[...], xt, preferred_element_type=jnp.float32) + b1_ref[...]
    h1 = jnp.maximum(h1, 0.0).astype(jnp.bfloat16)                          # (HP, TB)

    # Layer 2: (HP, HP) @ (HP, TB) -> (HP, TB).
    h2 = jnp.dot(w2t_ref[...], h1, preferred_element_type=jnp.float32) + b2_ref[...]
    h2 = jnp.maximum(h2, 0.0).astype(jnp.bfloat16)                          # (HP, TB)

    # Output layer: (1, HP) @ (HP, TB) -> (1, TB).  Batch on lanes -> unmasked,
    # lane-dense store.
    o_ref[...] = (
        jnp.dot(w3_ref[...], h2, preferred_element_type=jnp.float32) + b3_ref[...]
    )


def critic_forward(x, packed_params, *, block_batch=8192,
                   vmem_limit_bytes=48 * 1024 * 1024):
    """x: (B, state_size) float32 (or bf16).  Returns (B, 1) float32."""
    w1t, b1, w2t, b2, w3, b3 = packed_params
    B, S = x.shape

    # Batch tile selection:
    #  * big tiles (default 8192) amortize the ~0.35 us fixed per-grid-step cost and
    #    make each x/out DMA large enough to stream HBM efficiently;
    #  * clamp to half the (128-rounded) batch so the grid has >= 2 steps whenever the
    #    batch allows it, letting dimension_semantics=("parallel",) use both v7x TCs;
    #  * the 48 MiB VMEM limit keeps the largest tile inside v7x's 64 MiB/TC
    #    (v5e/v6e have 128 MiB, so it never binds there).
    half = _round_up((B + 1) // 2, LANE)
    tb = max(LANE, min(_round_up(block_batch, LANE), half))
    B_pad = _round_up(B, tb)
    grid = (B_pad // tb,)

    # No wrapper-side astype/pad passes over x: bf16 cast is in-kernel, and the ragged
    # tail is a standard Pallas partial input block (garbage rows only affect output
    # columns >= B, which are sliced off — rows are fully independent through the MLP).
    # Only when the whole batch is smaller than one tile do we pad (cheap at that size).
    if B < tb:
        x_in = jnp.pad(x, ((0, tb - B), (0, 0)))
    else:
        x_in = x

    const2 = lambda i: (0, 0)   # weights/biases: fetched once, resident in VMEM

    out = pl.pallas_call(
        critic_kernel,
        out_shape=jax.ShapeDtypeStruct((1, B_pad), jnp.float32),
        grid=grid,
        in_specs=[
            pl.BlockSpec((tb, S), lambda i: (i, 0)),   # pipelined batch tile of x
            pl.BlockSpec(w1t.shape, const2),
            pl.BlockSpec(b1.shape, const2),
            pl.BlockSpec(w2t.shape, const2),
            pl.BlockSpec(b2.shape, const2),
            pl.BlockSpec(w3.shape, const2),
            pl.BlockSpec(b3.shape, const2),
        ],
        out_specs=pl.BlockSpec((1, tb), lambda i: (0, i)),   # lane-dense output row
        compiler_params=pltpu.CompilerParams(
            dimension_semantics=("parallel",),   # shard batch tiles over v7x's 2 TCs
            vmem_limit_bytes=vmem_limit_bytes,
        ),
        # If per-step DMA latency is still exposed at very small tiles, add
        # pipeline_mode=pl.Buffered(3) on the x BlockSpec (optional; measure first).
    )(x_in, w1t, b1, w2t, b2, w3, b3)

    return out.reshape(B_pad, 1)[:B]


def init_critic_params(key, state_size, critic_hidden_size=24):
    """Unpadded f32 params, (in_features, out_features) layout.
    Mimics PyTorch nn.Linear default init U[-1/sqrt(fan_in), 1/sqrt(fan_in)]."""
    def linear(k, fan_in, fan_out):
        kw, kb = jax.random.split(k)
        bound = 1.0 / jnp.sqrt(jnp.float32(fan_in))
        w = jax.random.uniform(kw, (fan_in, fan_out), jnp.float32, -bound, bound)
        b = jax.random.uniform(kb, (fan_out,), jnp.float32, -bound, bound)
        return w, b

    k1, k2, k3 = jax.random.split(key, 3)
    w1, b1 = linear(k1, state_size, critic_hidden_size)
    w2, b2 = linear(k2, critic_hidden_size, critic_hidden_size)
    w3, b3 = linear(k3, critic_hidden_size, 1)
    return (w1, b1, w2, b2, w3, b3)


def pack_critic_params(params, compute_dtype=jnp.bfloat16):
    """Transpose weights to feature-major (out, in), zero-pad the hidden dim to the
    128-lane width, and cast matmul operands to bf16.  Padded bias entries and padded
    weight rows/cols are 0, so results are unchanged (do NOT change that)."""
    w1, b1, w2, b2, w3, b3 = params          # (in, out) layout, f32
    S, H = w1.shape
    HP = _round_up(max(H, LANE), LANE)

    w1t = jnp.zeros((HP, S), jnp.float32).at[:H, :].set(w1.T).astype(compute_dtype)
    b1c = jnp.zeros((HP, 1), jnp.float32).at[:H, 0].set(b1)
    w2t = jnp.zeros((HP, HP), jnp.float32).at[:H, :H].set(w2.T).astype(compute_dtype)
    b2c = jnp.zeros((HP, 1), jnp.float32).at[:H, 0].set(b2)
    w3r = jnp.zeros((1, HP), jnp.float32).at[0, :H].set(w3[:, 0]).astype(compute_dtype)
    b3r = b3.reshape(1, 1).astype(jnp.float32)
    return (w1t, b1c, w2t, b2c, w3r, b3r)


def critic_reference(x, params, compute_dtype=jnp.float32):
    """Pure-JAX reference (unpadded weights); compute_dtype controls matmul operands."""
    w1, b1, w2, b2, w3, b3 = params
    cd = compute_dtype
    h1 = jnp.maximum(
        jnp.dot(x.astype(cd), w1.astype(cd), preferred_element_type=jnp.float32) + b1,
        0.0)
    h2 = jnp.maximum(
        jnp.dot(h1.astype(cd), w2.astype(cd), preferred_element_type=jnp.float32) + b2,
        0.0)
    return jnp.dot(h2.astype(cd), w3.astype(cd),
                   preferred_element_type=jnp.float32) + b3


if __name__ == "__main__":
    key = jax.random.PRNGKey(0)
    k_params, k_x = jax.random.split(key)

    batch = 200          # NOT a multiple of the tile -> exercises the ragged tail
    state_size = 16
    hidden = 24

    params = init_critic_params(k_params, state_size, hidden)
    packed = pack_critic_params(params, compute_dtype=jnp.bfloat16)
    x = jax.random.normal(k_x, (batch, state_size), jnp.float32)

    # At this small batch the tile clamps to 128 -> a 2-step grid (multi-tile path).
    out = critic_forward(x, packed)
    out = jax.block_until_ready(out)
    assert out.shape == (batch, 1), out.shape

    # Tight check against a reference using the same bf16-operand compute path.
    ref_bf16 = critic_reference(x, params, compute_dtype=jnp.bfloat16)
    assert jnp.allclose(out, ref_bf16, atol=2e-2, rtol=2e-2), "mismatch vs bf16 reference"

    # Looser semantic check against the full-f32 PyTorch-equivalent math.
    ref_f32 = critic_reference(x, params, compute_dtype=jnp.float32)
    assert jnp.allclose(out, ref_f32, atol=1e-1, rtol=1e-1), "mismatch vs f32 reference"

    print("KERNEL_OK")
</pallas_src>

<mosaic_0001>
module attributes {stable_mosaic.version = 11 : i64} {
  func.func @critic_kernel(%arg0: i32, %arg1: memref<128x16xf32, #tpu.memory_space<vmem>>, %arg2: memref<128x16xbf16, #tpu.memory_space<vmem>>, %arg3: memref<128x1xf32, #tpu.memory_space<vmem>>, %arg4: memref<128x128xbf16, #tpu.memory_space<vmem>>, %arg5: memref<128x1xf32, #tpu.memory_space<vmem>>, %arg6: memref<1x128xbf16, #tpu.memory_space<vmem>>, %arg7: memref<1x1xf32, #tpu.memory_space<vmem>>, %arg8: memref<1x128xf32, #tpu.memory_space<vmem>>) attributes {dimension_semantics = [#tpu.dimension_semantics<parallel>], iteration_bounds = array<i64: 2>, scalar_prefetch = 0 : i64, scratch_operands = 0 : i64, tpu.core_type = #tpu.core_type<tc>, window_params = [{transform_indices = @transform_0, window_bounds = array<i64: 128, 16>}, {pipeline_mode = #tpu.pipeline_mode<synchronous>, transform_indices = @transform_1, window_bounds = array<i64: 128, 16>}, {pipeline_mode = #tpu.pipeline_mode<synchronous>, transform_indices = @transform_2, window_bounds = array<i64: 128, 1>}, {pipeline_mode = #tpu.pipeline_mode<synchronous>, transform_indices = @transform_3, window_bounds = array<i64: 128, 128>}, {pipeline_mode = #tpu.pipeline_mode<synchronous>, transform_indices = @transform_4, window_bounds = array<i64: 128, 1>}, {pipeline_mode = #tpu.pipeline_mode<synchronous>, transform_indices = @transform_5, window_bounds = array<i64: 1, 128>}, {pipeline_mode = #tpu.pipeline_mode<synchronous>, transform_indices = @transform_6, window_bounds = array<i64: 1, 1>}, {transform_indices = @transform_7, window_bounds = array<i64: 1, 128>}]} {
    %c0 = arith.constant 0 : index
    %c0_0 = arith.constant 0 : index
    %0 = vector.load %arg1[%c0, %c0_0] : memref<128x16xf32, #tpu.memory_space<vmem>>, vector<128x16xf32>
    %1 = tpu.transpose %0, [1, 0] : vector<128x16xf32> -> vector<16x128xf32>
    %2 = arith.truncf %1 : vector<16x128xf32> to vector<16x128xbf16>
    %c0_1 = arith.constant 0 : index
    %c0_2 = arith.constant 0 : index
    %3 = vector.load %arg2[%c0_1, %c0_2] : memref<128x16xbf16, #tpu.memory_space<vmem>>, vector<128x16xbf16>
    %cst = arith.constant dense<0.000000e+00> : vector<128x128xf32>
    %4 = tpu.matmul %3, %2, %cst {dimension_numbers = #tpu.dot_dimension_numbers<[1], [0], [0], [1], [0, 0, 1, 1], [], []>} : vector<128x16xbf16>, vector<16x128xbf16>, vector<128x128xf32> -> vector<128x128xf32>
    %c0_3 = arith.constant 0 : index
    %c0_4 = arith.constant 0 : index
    %5 = vector.load %arg3[%c0_3, %c0_4] : memref<128x1xf32, #tpu.memory_space<vmem>>, vector<128x1xf32>
    %6 = vector.broadcast %5 : vector<128x1xf32> to vector<128x128xf32>
    %7 = arith.addf %4, %6 : vector<128x128xf32>
    %cst_5 = arith.constant 0.000000e+00 : f32
    %8 = vector.broadcast %cst_5 : f32 to vector<128x128xf32>
    %9 = arith.maximumf %7, %8 : vector<128x128xf32>
    %10 = arith.truncf %9 : vector<128x128xf32> to vector<128x128xbf16>
    %c0_6 = arith.constant 0 : index
    %c0_7 = arith.constant 0 : index
    %11 = vector.load %arg4[%c0_6, %c0_7] : memref<128x128xbf16, #tpu.memory_space<vmem>>, vector<128x128xbf16>
    %cst_8 = arith.constant dense<0.000000e+00> : vector<128x128xf32>
    %12 = tpu.matmul %11, %10, %cst_8 {dimension_numbers = #tpu.dot_dimension_numbers<[1], [0], [0], [1], [0, 0, 1, 1], [], []>} : vector<128x128xbf16>, vector<128x128xbf16>, vector<128x128xf32> -> vector<128x128xf32>
    %c0_9 = arith.constant 0 : index
    %c0_10 = arith.constant 0 : index
    %13 = vector.load %arg5[%c0_9, %c0_10] : memref<128x1xf32, #tpu.memory_space<vmem>>, vector<128x1xf32>
    %14 = vector.broadcast %13 : vector<128x1xf32> to vector<128x128xf32>
    %15 = arith.addf %12, %14 : vector<128x128xf32>
    %cst_11 = arith.constant 0.000000e+00 : f32
    %16 = vector.broadcast %cst_11 : f32 to vector<128x128xf32>
    %17 = arith.maximumf %15, %16 : vector<128x128xf32>
    %18 = arith.truncf %17 : vector<128x128xf32> to vector<128x128xbf16>
    %c0_12 = arith.constant 0 : index
    %c0_13 = arith.constant 0 : index
    %19 = vector.load %arg6[%c0_12, %c0_13] : memref<1x128xbf16, #tpu.memory_space<vmem>>, vector<1x128xbf16>
    %cst_14 = arith.constant dense<0.000000e+00> : vector<1x128xf32>
    %20 = tpu.matmul %19, %18, %cst_14 {dimension_numbers = #tpu.dot_dimension_numbers<[1], [0], [0], [1], [0, 0, 1, 1], [], []>} : vector<1x128xbf16>, vector<128x128xbf16>, vector<1x128xf32> -> vector<1x128xf32>
    %c0_15 = arith.constant 0 : index
    %c0_16 = arith.constant 0 : index
    %21 = vector.load %arg7[%c0_15, %c0_16] : memref<1x1xf32, #tpu.memory_space<vmem>>, vector<1x1xf32>
    %22 = vector.broadcast %21 : vector<1x1xf32> to vector<1x128xf32>
    %23 = arith.addf %20, %22 : vector<1x128xf32>
    %c0_17 = arith.constant 0 : index
    %c0_18 = arith.constant 0 : index
    %24 = vector.load %arg8[%c0_17, %c0_18] : memref<1x128xf32, #tpu.memory_space<vmem>>, vector<1x128xf32>
    tpu.vector_store %arg8[%c0_17, %c0_18], %23 {strides = array<i32>} : memref<1x128xf32, #tpu.memory_space<vmem>>, vector<1x128xf32>,
    return
  }
  func.func @transform_0(%arg0: i32) -> (i32, i32) {
    %c0_i32 = arith.constant 0 : i32
    %c0_i32_0 = arith.constant 0 : i32
    return %arg0, %c0_i32 : i32, i32
  }
  func.func @transform_1(%arg0: i32) -> (i32, i32) {
    %c0_i32 = arith.constant 0 : i32
    %c0_i32_0 = arith.constant 0 : i32
    %c0_i32_1 = arith.constant 0 : i32
    return %c0_i32, %c0_i32_0 : i32, i32
  }
  func.func @transform_2(%arg0: i32) -> (i32, i32) {
    %c0_i32 = arith.constant 0 : i32
    %c0_i32_0 = arith.constant 0 : i32
    %c0_i32_1 = arith.constant 0 : i32
    return %c0_i32, %c0_i32_0 : i32, i32
  }
  func.func @transform_3(%arg0: i32) -> (i32, i32) {
    %c0_i32 = arith.constant 0 : i32
    %c0_i32_0 = arith.constant 0 : i32
    %c0_i32_1 = arith.constant 0 : i32
    return %c0_i32, %c0_i32_0 : i32, i32
  }
  func.func @transform_4(%arg0: i32) -> (i32, i32) {
    %c0_i32 = arith.constant 0 : i32
    %c0_i32_0 = arith.constant 0 : i32
    %c0_i32_1 = arith.constant 0 : i32
    return %c0_i32, %c0_i32_0 : i32, i32
  }
  func.func @transform_5(%arg0: i32) -> (i32, i32) {
    %c0_i32 = arith.constant 0 : i32
    %c0_i32_0 = arith.constant 0 : i32
    %c0_i32_1 = arith.constant 0 : i32
    return %c0_i32, %c0_i32_0 : i32, i32
  }
  func.func @transform_6(%arg0: i32) -> (i32, i32) {
    %c0_i32 = arith.constant 0 : i32
    %c0_i32_0 = arith.constant 0 : i32
    %c0_i32_1 = arith.constant 0 : i32
    return %c0_i32, %c0_i32_0 : i32, i32
  }
  func.func @transform_7(%arg0: i32) -> (i32, i32) {
    %c0_i32 = arith.constant 0 : i32
    %c0_i32_0 = arith.constant 0 : i32
    return %c0_i32, %arg0 : i32, i32
  }
}

</mosaic_0001>

<bundles_post_ra>
// kernel: tpu_custom_call.1
= control target key start
LH: loop header
LB: loop body
LE: loop exit
PB: predicated region body
PF: predicated region fallthrough
CT: control target
= control target key end

     0   :  { %s1449_s0 = inlined_call_operand.vmem [shape: f32[200,16], index: 0, kind: input, shape index: {}]   ;;  %s1450_s1 = inlined_call_operand.vmem [shape: bf16[128,16], index: 1, kind: input, shape index: {}]   ;;  %s1451_s2 = inlined_call_operand.vmem [shape: f32[128,1], index: 2, kind: input, shape index: {}]   ;;  %s1452_s3 = inlined_call_operand.vmem [shape: bf16[128,128], index: 3, kind: input, shape index: {}]   ;;  %s1453_s4 = inlined_call_operand.vmem [shape: f32[128,1], index: 4, kind: input, shape index: {}]   ;;  %s1454_s5 = inlined_call_operand.vmem [shape: bf16[1,128], index: 5, kind: input, shape index: {}]   ;;  %s1455_s6 = inlined_call_operand.<no memory space> [shape: f32[1,1], index: 6, kind: input, shape index: {}]   ;;  %s1456_s7 = inlined_call_operand.hbm [shape: f32[1,256], index: 7, kind: output, shape index: {}]  }
   0x1   :  { %v12_v0 = vstv %s1455_s6 }
   0x2   :  { %13 = vst [vmem:[#allocation2] sm:$0x1] %v12_v0 }
   0x3   :  { %14 = vsyncpa [#allocation4], 0 }
   0x4   :  { %16 = vsyncpa [#allocation4 + $0x1], 0  ;;  %s1179_s26 = smov 0   ;;  %s1181_s27 = smov 0  }
   0x5   :  { %s1183_s28 = smov 0   ;;  %s1185_s29 = smov 0  }
   0x6 LB: > { %s1200_s6 = sadd.s32 4294967295, %s1133_s29   ;;  %s923_s30 = sadd.s32 4294967294, %s1133_s29   ;;  %s1133_s29 = sphi %s1185_s29, %s1462_s29   ;;  %s1129_s28 = sphi %s1183_s28, %s1461_s28   ;;  %s1125_s27 = sphi %s1181_s27, %s1460_s27   ;;  %s1121_s26 = sphi %s1179_s26, %s1459_s26  }
   0x7   : > { %s1204_s8 = sadd.s32 1, %s1133_s29   ;;  %s181_s9 = sadd.s32 1, %s1129_s28 }
   0x8   : > { %s178_s10 = ssub.s32 %s1133_s29, %s1204_s8  ;;  %p191_p0 = scmp.ne.s32.totalorder %s1129_s28, %s1125_s27 }
   0x9   : > { %p179_p1 = scmp.eq.s32.totalorder %s178_s10, 0  ;;  %p192_p2 = scmp.eq.s32.totalorder %s1200_s6, 1 }
   0xa   : > { %p197_p3 = scmp.ne.s32.totalorder %s1125_s27, %s1121_s26  ;;  %p198_p4 = scmp.eq.s32.totalorder %s923_s30, 1 }
   0xb   : > { %s1215_s11 = scalar_select %p179_p1, %s1129_s28, %s181_s9  }
   0xc   : > { %p1217_p5 = por %p192_p2, %p191_p0  ;;  %p1221_p6 = por %p198_p4, %p197_p3 }
   0xd   : > { %p926_p7 = scmp.ge.s32.totalorder %s1133_s29, 1  ;;  %p251_p8 = scmp.lt.s32.totalorder %s1133_s29, 3 }
   0xf   : > { %p252_p9 = pnand %p926_p7, %p251_p8 }
  0x10   : > { %s927_s14 = sshll.u32 (!%p252_p9), %s1200_s6, 4  ;;  %s284_s9 = sand.u32 (!%p252_p9), 1, %s1125_s27  }
  0x11   : > { %255 = sbr.rel (%p252_p9) target bundleno = 812 (0x32c), region = 48  ;;  %p291_p10 = scmp.lt.s32.totalorder (!%p252_p9), %s927_s14, 24 }
  0x12   : > { %s285_s16 = scalar_lea.vmem (!%p252_p9), [#allocation3], %s284_s9  ;;  %s856_s20 = scalar_lea.sflag (!%p252_p9), [#allocation4], %s284_s9 }
  0x13   : > { %s866_s17 = sshll.u32 (!%p252_p9), %s285_s16, 4  ;;  %s867_s17 = int_to_ptr.vmem [resolvable:$true] %s866_s17 }
  0x16   : > { %s1464_s14 = smov (!%p291_p10, %s927_s14), 24  ;;  %v1135_v12 = vmov 0   ;;  %v380_v14 = vld [vmem:[%s1451_s2 + $0x70] sm:$0xff]  ;;  %v378_v15 = vld [vmem:[%s1451_s2 + $0x60] sm:$0xff]  ;;  %v381_v17 = vld [vmem:[%s1451_s2 + $0x78] sm:$0xff]  ;;  %vm502_vm0 = vcmask 130048  }
  0x17   : > { %s928_s15 = sshll.u32 %s1464_s14, 3  ;;  %1068 = vset.pattern.permute.xlu1 %v1135_v12  ;;  %1069 = vset.pattern.permute.xlu2 %v1135_v12  ;;  %v379_v18 = vld [vmem:[%s1451_s2 + $0x68] sm:$0xff]  ;;  %v376_v20 = vld [vmem:[%s1451_s2 + $0x50] sm:$0xff]  ;;  %v377_v21 = vld [vmem:[%s1451_s2 + $0x58] sm:$0xff] }
  0x18   : > { %s1231_s18 = scalar_lea.vmem %s1449_s0, %s928_s15  ;;  %454 = vperm.xlu1 %1068, %v380_v14   ;;  %444 = vperm.xlu2 %1069, %v378_v15   ;;  %v374_v23 = vld [vmem:[%s1451_s2 + $0x40] sm:$0xff]  ;;  %v372_v25 = vld [vmem:[%s1451_s2 + $0x30] sm:$0xff]  ;;  %v375_v27 = vld [vmem:[%s1451_s2 + $0x48] sm:$0xff]  ;;  %s864_s15 = scalar_lea.hbm %s1456_s7, %s1200_s6 }
  0x19   : > { %v301_v1 = vld [vmem:[%s1231_s18] sm:$0xff]  ;;  %v302_v2 = vld [vmem:[%s1231_s18 + $0x8] sm:$0xff]  ;;  %v303_v3 = vld [vmem:[%s1231_s18 + $0x10] sm:$0xff]  ;;  %s868_s19 = sshll.u32 %s864_s15, 4  ;;  %s1091_s6 = scalar_lea.hbm %s1456_s7, 2  ;;  %s869_s19 = int_to_ptr.hbm [resolvable:$true] %s868_s19 }
  0x1a   : > { %317 = vxpose.xlu0.b32.start [1/16] (narrow) %v301_v1, 16  ;;  %v304_v4 = vld [vmem:[%s1231_s18 + $0x18] sm:$0xff]  ;;  %v305_v5 = vld [vmem:[%s1231_s18 + $0x20] sm:$0xff]  ;;  %v306_v6 = vld [vmem:[%s1231_s18 + $0x28] sm:$0xff]  ;;  %s1085_s21 = sshra.s32 %s869_s19, 4  ;;  %s1086_s21 = int_to_ptr.hbm [resolvable:$true] %s1085_s21 }
  0x1b   : > { %v307_v7 = vld [vmem:[%s1231_s18 + $0x30] sm:$0xff]  ;;  %v308_v8 = vld [vmem:[%s1231_s18 + $0x38] sm:$0xff]  ;;  %v309_v9 = vld [vmem:[%s1231_s18 + $0x40] sm:$0xff]  ;;  %s1087_s22 = scalar_lea.hbm %s1086_s21, 1  ;;  %p1092_p0 = scmp.lt.s32.totalorder %s1086_s21, %s1456_s7 }
  0x1c   : > { %v310_v10 = vld [vmem:[%s1231_s18 + $0x48] sm:$0xff]  ;;  %v311_v11 = vld [vmem:[%s1231_s18 + $0x50] sm:$0xff]  ;;  %v312_v13 = vld [vmem:[%s1231_s18 + $0x58] sm:$0xff]  ;;  %p1088_p11 = scmp.ne.s32.totalorder %s1086_s21, %s1087_s22  ;;  %p1093_p1 = scmp.lt.s32.totalorder %s1091_s6, %s1087_s22 }
  0x1d   : > { %v313_v16 = vld [vmem:[%s1231_s18 + $0x60] sm:$0xff]  ;;  %v314_v19 = vld [vmem:[%s1231_s18 + $0x68] sm:$0xff]  ;;  %v315_v22 = vld [vmem:[%s1231_s18 + $0x70] sm:$0xff] }
  0x1e   : > { %v316_v24 = vld [vmem:[%s1231_s18 + $0x78] sm:$0xff]  ;;  %v370_v26 = vld [vmem:[%s1451_s2 + $0x20] sm:$0xff]  ;;  %v368_v28 = vld [vmem:[%s1451_s2 + $0x10] sm:$0xff]  ;;  %p1089_p12 = pnand %p1088_p11, %p1217_p5  ;;  %p1094_p2 = por %p1093_p1, %p1092_p0 }
  0x1f   : > { %v373_v29 = vld [vmem:[%s1451_s2 + $0x38] sm:$0xff]  ;;  %v366_v30 = vld [vmem:[%s1451_s2] sm:$0xff]  ;;  %v371_v31 = vld [vmem:[%s1451_s2 + $0x28] sm:$0xff] }
  0x20   : > { %459 = vperm.xlu1 %1068, %v381_v17   ;;  %449 = vperm.xlu2 %1069, %v379_v18   ;;  %v630_v32 = vld [vmem:[%s1453_s4 + $0x70] sm:$0xff]  ;;  %v369_v33 = vld [vmem:[%s1451_s2 + $0x18] sm:$0xff]  ;;  %v628_v34 = vld [vmem:[%s1453_s4 + $0x60] sm:$0xff]  ;;  %p1090_p13 = pneg %p1089_p12 }
  0x21   : > { %v367_v36 = vld [vmem:[%s1451_s2 + $0x8] sm:$0xff]  ;;  %v626_v37 = vld [vmem:[%s1453_s4 + $0x50] sm:$0xff]  ;;  %v631_v40 = vld [vmem:[%s1453_s4 + $0x78] sm:$0xff] }
  0x22   : > { %318 = vxpose.xlu0.b32.cont [2/16] (narrow) %v302_v2, 16  ;;  %v1003_v41 = vld [vmem:[%s1450_s1] sm:$0xff]  ;;  %v1009_v42 = vld [vmem:[%s1450_s1 + $0x30] sm:$0xff]  ;;  %v629_v44 = vld [vmem:[%s1453_s4 + $0x68] sm:$0xff]  ;;  %p1095_p3 = pnand %p1094_p2, %p1090_p13 }
  0x23   : > { %v624_v43 = vld [vmem:[%s1453_s4 + $0x40] sm:$0xff]  ;;  %v622_v45 = vld [vmem:[%s1453_s4 + $0x30] sm:$0xff]  ;;  %v627_v46 = vld [vmem:[%s1453_s4 + $0x58] sm:$0xff] }
  0x24   : > { %v1004_v47 = vld [vmem:[%s1450_s1 + $0x8] sm:$0xff]  ;;  %v1010_v48 = vld [vmem:[%s1450_s1 + $0x38] sm:$0xff]  ;;  %v620_v49 = vld [vmem:[%s1453_s4 + $0x20] sm:$0xff] }
  0x25   : > { %v625_v50 = vld [vmem:[%s1453_s4 + $0x48] sm:$0xff]  ;;  %v618_v51 = vld [vmem:[%s1453_s4 + $0x10] sm:$0xff]  ;;  %v623_v52 = vld [vmem:[%s1453_s4 + $0x38] sm:$0xff] }
  0x26   : > { %v1005_v53 = vld [vmem:[%s1450_s1 + $0x10] sm:$0xff]  ;;  %v616_v54 = vld [vmem:[%s1453_s4] sm:$0xff]  ;;  %v621_v55 = vld [vmem:[%s1453_s4 + $0x28] sm:$0xff] }
  0x27   : > { %v619_v56 = vld [vmem:[%s1453_s4 + $0x18] sm:$0xff]  ;;  %v617_v58 = vld [vmem:[%s1453_s4 + $0x8] sm:$0xff]  ;;  %v1007_v59 = vld [vmem:[%s1450_s1 + $0x20] sm:$0xff] }
  0x28   : > { %434 = vperm.xlu1 %1068, %v376_v20   ;;  %439 = vperm.xlu2 %1069, %v377_v21   ;;  %v1006_v57 = vld [vmem:[%s1450_s1 + $0x18] sm:$0xff]  ;;  %v1008_v0 = vld [vmem:[%s1450_s1 + $0x28] sm:$0xff] }
  0x2a   : > { %319 = vxpose.xlu0.b32.cont [3/16] (narrow) %v303_v3, 16 }
  0x30   : > { %424 = vperm.xlu1 %1068, %v374_v23   ;;  %429 = vperm.xlu2 %1069, %v375_v27  }
  0x32   : > { %320 = vxpose.xlu0.b32.cont [4/16] (narrow) %v304_v4, 16 }
  0x38   : > { %414 = vperm.xlu1 %1068, %v372_v25   ;;  %419 = vperm.xlu2 %1069, %v373_v29  }
  0x3a   : > { %321 = vxpose.xlu0.b32.cont [5/16] (narrow) %v305_v5, 16 }
  0x40   : > { %404 = vperm.xlu1 %1068, %v370_v26   ;;  %409 = vperm.xlu2 %1069, %v371_v31  }
  0x42   : > { %322 = vxpose.xlu0.b32.cont [6/16] (narrow) %v306_v6, 16 }
  0x48   : > { %394 = vperm.xlu1 %1068, %v368_v28   ;;  %399 = vperm.xlu2 %1069, %v369_v33  }
  0x4a   : > { %323 = vxpose.xlu0.b32.cont [7/16] (narrow) %v307_v7, 16 }
  0x50   : > { %384 = vperm.xlu1 %1068, %v366_v30   ;;  %389 = vperm.xlu2 %1069, %v367_v36  }
  0x52   : > { %324 = vxpose.xlu0.b32.cont [8/16] (narrow) %v308_v8, 16 }
  0x58   : > { %704 = vperm.xlu1 %1068, %v630_v32   ;;  %709 = vperm.xlu2 %1069, %v631_v40  }
  0x5a   : > { %325 = vxpose.xlu0.b32.cont [9/16] (narrow) %v309_v9, 16 }
  0x60   : > { %694 = vperm.xlu1 %1068, %v628_v34   ;;  %699 = vperm.xlu2 %1069, %v629_v44  }
  0x62   : > { %326 = vxpose.xlu0.b32.cont [10/16] (narrow) %v310_v10, 16 }
  0x68   : > { %684 = vperm.xlu1 %1068, %v626_v37   ;;  %689 = vperm.xlu2 %1069, %v627_v46  }
  0x6a   : > { %327 = vxpose.xlu0.b32.cont [11/16] (narrow) %v311_v11, 16 }
  0x70   : > { %674 = vperm.xlu1 %1068, %v624_v43   ;;  %679 = vperm.xlu2 %1069, %v625_v50  }
  0x72   : > { %328 = vxpose.xlu0.b32.cont [12/16] (narrow) %v312_v13, 16  ;;  %v445_v61 = vpop.permute.xlu2 %444 }
  0x78   : > { %664 = vperm.xlu1 %1068, %v622_v45   ;;  %669 = vperm.xlu2 %1069, %v623_v52  }
  0x7a   : > { %329 = vxpose.xlu0.b32.cont [13/16] (narrow) %v313_v16, 16  ;;  %v450_v63 = vpop.permute.xlu2 %449 }
  0x80   : > { %654 = vperm.xlu1 %1068, %v620_v49   ;;  %659 = vperm.xlu2 %1069, %v621_v55  }
  0x82   : > { %330 = vxpose.xlu0.b32.cont [14/16] (narrow) %v314_v19, 16  ;;  %v440_v2 = vpop.permute.xlu2 %439 }
  0x88   : > { %644 = vperm.xlu1 %1068, %v618_v51   ;;  %649 = vperm.xlu2 %1069, %v619_v56  }
  0x8a   : > { %331 = vxpose.xlu0.b32.cont [15/16] (narrow) %v315_v22, 16  ;;  %v455_v60 = vpop.permute.xlu1 %454  ;;  %v430_v4 = vpop.permute.xlu2 %429 }
  0x90   : > { %634 = vperm.xlu1 %1068, %v616_v54   ;;  %639 = vperm.xlu2 %1069, %v617_v58  }
  0x92   : > { %332 = vxpose.xlu0.b32.end [16/16] (narrow) %v316_v24, 16  ;;  %v460_v62 = vpop.permute.xlu1 %459  ;;  %v420_v6 = vpop.permute.xlu2 %419 }
  0x9a   : > { %v435_v1 = vpop.permute.xlu1 %434  ;;  %v410_v8 = vpop.permute.xlu2 %409 }
  0xa2   : > { %v425_v3 = vpop.permute.xlu1 %424  ;;  %v400_v10 = vpop.permute.xlu2 %399 }
  0xaa   : > { %v415_v5 = vpop.permute.xlu1 %414  ;;  %v390_v15 = vpop.permute.xlu2 %389 }
  0xb2   : > { %v405_v7 = vpop.permute.xlu1 %404 }
  0xba   : > { %v395_v9 = vpop.permute.xlu1 %394 }
  0xbe   : > { %v333_v35 = vpop.trf.xlu0 }
  0xc6   : > { %v334_v38 = vpop.trf.xlu0 }
  0xc7   : > { %v349_v39 = vpack.c.bf16 %v334_v38, %v333_v35 }
  0xc9   : > { %534 = vmatpush.bf16.msra.mxu0 %v349_v39  ;;  %1019 = vmatpush.bf16.msra.mxu2 %v349_v39 }
  0xcc   : > { %961 = vmatmul.msk.bf16.vlgmr.msra.gmra.mxu0 %vm502_vm0, %v1003_v41  ;;  %967 = vmatmul.msk.bf16.vlgmr.msra.gmra.mxu2 %vm502_vm0, %v1009_v42 }
  0xdc   : > { %962 = vmatmul.msk.bf16.gmra.mxu0 %vm502_vm0, %v1004_v47  ;;  %968 = vmatmul.msk.bf16.gmra.mxu2 %vm502_vm0, %v1010_v48 }
  0xec   : > { %963 = vmatmul.msk.bf16.gmra.mxu0 %vm502_vm0, %v1005_v53 }
  0xf9   : > { %1070 = vset.pattern.permute.xlu0 %v1135_v12  ;;  %v385_v12 = vpop.permute.xlu1 %384 }
  0xfc   : > { %964 = vmatmul.msk.bf16.gmra.mxu0 %vm502_vm0, %v1006_v57 }
 0x10c   : > { %965 = vmatmul.msk.bf16.gmra.mxu0 %vm502_vm0, %v1007_v59 }
 0x11c   : > { %966 = vmatmul.msk.bf16.gmra.mxu0 %vm502_vm0, %v1008_v0 }
 0x149   : > { %v536_v11 = vpop.f32.mrf.mxu0 }
 0x14a   : > { %v537_v14 = vadd.f32 %v536_v11, %v385_v12  ;;  %v1014_v11 = vld [vmem:[%s1452_s3 + $0x18] sm:$0xff] }
 0x14b   : > { %v1018_v12 = vld [vmem:[%s1452_s3 + $0x38] sm:$0xff] }
 0x14c   : > { %v576_v18 = vmax.f32 %v537_v14, 0.0 }
 0x14f   : > { %v566_v13 = vpop.f32.mrf.mxu2 }
 0x150   : > { %v567_v30 = vadd.f32 %v566_v13, %v445_v61 }
 0x151   : > { %v538_v16 = vpop.f32.mrf.mxu0 }
 0x152   : > { %v539_v17 = vadd.f32 %v538_v16, %v390_v15  ;;  %v588_v37 = vmax.f32 %v567_v30, 0.0 }
 0x154   : > { %v577_v19 = vmax.f32 %v539_v17, 0.0  ;;  %v710_v17 = vpop.permute.xlu2 %709 }
 0x156   : > { %v1380_v20 = vpack.c.bf16 %v577_v19, %v576_v18  ;;  %v705_v18 = vpop.permute.xlu1 %704 }
 0x157   : > { %v568_v21 = vpop.f32.mrf.mxu2 }
 0x158   : > { %v569_v31 = vadd.f32 %v568_v21, %v450_v63 }
 0x159   : > { %v541_v22 = vpop.f32.mrf.mxu0 }
 0x15a   : > { %v542_v24 = vadd.f32 %v541_v22, %v395_v9  ;;  %v589_v38 = vmax.f32 %v569_v31, 0.0  ;;  %v1013_v9 = vld [vmem:[%s1452_s3 + $0x10] sm:$0xff] }
 0x15c   : > { %v578_v27 = vmax.f32 %v542_v24, 0.0  ;;  %v598_v41 = vpack.c.bf16 %v589_v38, %v588_v37  ;;  %v700_v21 = vpop.permute.xlu2 %699 }
 0x15e   : > { %v695_v22 = vpop.permute.xlu1 %694 }
 0x15f   : > { %v571_v23 = vpop.f32.mrf.mxu2 }
 0x160   : > { %v572_v29 = vadd.f32 %v571_v23, %v455_v60 }
 0x161   : > { %v543_v25 = vpop.f32.mrf.mxu0 }
 0x162   : > { %v544_v26 = vadd.f32 %v543_v25, %v400_v10  ;;  %v590_v34 = vmax.f32 %v572_v29, 0.0  ;;  %v1017_v10 = vld [vmem:[%s1452_s3 + $0x30] sm:$0xff] }
 0x164   : > { %v579_v28 = vmax.f32 %v544_v26, 0.0  ;;  %v690_v25 = vpop.permute.xlu2 %689 }
 0x166   : > { %v593_v32 = vpack.c.bf16 %v579_v28, %v578_v27  ;;  %v685_v26 = vpop.permute.xlu1 %684 }
 0x167   : > { %v573_v33 = vpop.f32.mrf.mxu2 }
 0x168   : > { %v574_v35 = vadd.f32 %v573_v33, %v460_v62 }
 0x169   : > { %v546_v36 = vpop.f32.mrf.mxu0 }
 0x16a   : > { %v591_v39 = vmax.f32 %v574_v35, 0.0  ;;  %v547_v63 = vadd.f32 %v546_v36, %v405_v7  ;;  %v1012_v7 = vld [vmem:[%s1452_s3 + $0x8] sm:$0xff] }
 0x16c   : > { %v599_v40 = vpack.c.bf16 %v591_v39, %v590_v34  ;;  %v680_v29 = vpop.permute.xlu2 %679 }
 0x16e   : > { %760 = vmatpush.bf16.msra.mxu1 %v599_v40  ;;  %1020 = vmatpush.bf16.msra.mxu3 %v599_v40  ;;  %v675_v31 = vpop.permute.xlu1 %674 }
 0x171   : > { %v548_v42 = vpop.f32.mrf.mxu0 }
 0x172   : > { %761 = vmatpush.bf16.msra.mxu1 %v598_v41  ;;  %1021 = vmatpush.bf16.msra.mxu3 %v598_v41  ;;  %v549_v60 = vadd.f32 %v548_v42, %v410_v8  ;;  %v1016_v8 = vld [vmem:[%s1452_s3 + $0x28] sm:$0xff] }
 0x174   : > { %v670_v34 = vpop.permute.xlu2 %669 }
 0x176   : > { %v665_v35 = vpop.permute.xlu1 %664 }
 0x179   : > { %v551_v43 = vpop.f32.mrf.mxu0 }
 0x17a   : > { %v552_v58 = vadd.f32 %v551_v43, %v415_v5  ;;  %v1011_v5 = vld [vmem:[%s1452_s3] sm:$0xff] }
 0x17c   : > { %v582_v0 = vmax.f32 %v552_v58, 0.0 }
 0x181   : > { %v553_v44 = vpop.f32.mrf.mxu0 }
 0x182   : > { %v554_v55 = vadd.f32 %v553_v44, %v420_v6  ;;  %v1015_v6 = vld [vmem:[%s1452_s3 + $0x20] sm:$0xff]  ;;  %v660_v44 = vpop.permute.xlu2 %659 }
 0x184   : > { %v583_v61 = vmax.f32 %v554_v55, 0.0 }
 0x189   : > { %v556_v45 = vpop.f32.mrf.mxu0 }
 0x18a   : > { %v557_v52 = vadd.f32 %v556_v45, %v425_v3 }
 0x18c   : > { %v584_v59 = vmax.f32 %v557_v52, 0.0 }
 0x191   : > { %v558_v46 = vpop.f32.mrf.mxu0 }
 0x192   : > { %v559_v50 = vadd.f32 %v558_v46, %v430_v4  ;;  %v595_v4 = vpack.c.bf16 %v583_v61, %v582_v0  ;;  %v650_v61 = vpop.permute.xlu2 %649 }
 0x194   : > { %v585_v56 = vmax.f32 %v559_v50, 0.0 }
 0x196   : > { %v596_v62 = vpack.c.bf16 %v585_v56, %v584_v59 }
 0x199   : > { %v561_v47 = vpop.f32.mrf.mxu0 }
 0x19a   : > { %v562_v48 = vadd.f32 %v561_v47, %v435_v1  ;;  %v581_v1 = vmax.f32 %v549_v60, 0.0 }
 0x19c   : > { %v586_v53 = vmax.f32 %v562_v48, 0.0  ;;  %v655_v48 = vpop.permute.xlu1 %654 }
 0x1a1   : > { %v563_v49 = vpop.f32.mrf.mxu0 }
 0x1a2   : > { %v564_v51 = vadd.f32 %v563_v49, %v440_v2  ;;  %v580_v2 = vmax.f32 %v547_v63, 0.0  ;;  %v834_v49 = vld [vmem:[#allocation2] sm:$0x1] }
 0x1a3   : > { %837 = vperm.xlu0 %1070, %v834_v49  }
 0x1a4   : > { %v587_v54 = vmax.f32 %v564_v51, 0.0  ;;  %v594_v3 = vpack.c.bf16 %v581_v1, %v580_v2  ;;  %v645_v0 = vpop.permute.xlu1 %644 }
 0x1a6   : > { %v597_v57 = vpack.c.bf16 %v587_v54, %v586_v53 }
 0x1a8   : > { %762 = vmatpush.bf16.msra.mxu1 %v597_v57  ;;  %1022 = vmatpush.bf16.msra.mxu3 %v597_v57 }
 0x1ac   : > { %763 = vmatpush.bf16.msra.mxu1 %v596_v62  ;;  %1023 = vmatpush.bf16.msra.mxu3 %v596_v62 }
 0x1b0   : > { %764 = vmatpush.bf16.msra.mxu1 %v595_v4  ;;  %1024 = vmatpush.bf16.msra.mxu3 %v595_v4 }
 0x1b4   : > { %765 = vmatpush.bf16.msra.mxu1 %v594_v3  ;;  %1025 = vmatpush.bf16.msra.mxu3 %v594_v3 }
 0x1b8   : > { %766 = vmatpush.bf16.msra.mxu1 %v593_v32  ;;  %1026 = vmatpush.bf16.msra.mxu3 %v593_v32 }
 0x1bc   : > { %767 = vmatpush.bf16.msra.mxu1 %v1380_v20  ;;  %1027 = vmatpush.bf16.msra.mxu3 %v1380_v20 }
 0x1bf   : > { %768 = vmatmul.bf16.vlgmr.msra.gmra.mxu1 %v1011_v5  ;;  %788 = vmatmul.bf16.vlgmr.msra.gmra.mxu3 %v1015_v6 }
 0x1cf   : > { %773 = vmatmul.bf16.gmra.mxu1 %v1012_v7  ;;  %793 = vmatmul.bf16.gmra.mxu3 %v1016_v8 }
 0x1df   : > { %778 = vmatmul.bf16.gmra.mxu1 %v1013_v9  ;;  %798 = vmatmul.bf16.gmra.mxu3 %v1017_v10 }
 0x1ef   : > { %783 = vmatmul.bf16.gmra.mxu1 %v1014_v11  ;;  %803 = vmatmul.bf16.gmra.mxu3 %v1018_v12  ;;  %v640_v11 = vpop.permute.xlu2 %639 }
 0x23c   : > { %v1408_v13 = vpop.f32.mrf.mxu1 }
 0x242   : > { %v789_v14 = vpop.f32.mrf.mxu3 }
 0x243   : > { %v790_v56 = vadd.f32 %v789_v14, %v675_v31 }
 0x244   : > { %v1410_v15 = vpop.f32.mrf.mxu1 }
 0x245   : > { %v817_v62 = vmax.f32 %v790_v56, 0.0  ;;  %v772_v12 = vadd.f32 %v1410_v15, %v640_v11  ;;  %v838_v15 = vpop.permute.xlu0 %837 }
 0x24a   : > { %v791_v16 = vpop.f32.mrf.mxu3 }
 0x24b   : > { %v792_v52 = vadd.f32 %v791_v16, %v680_v29 }
 0x24c   : > { %v774_v19 = vpop.f32.mrf.mxu1 }
 0x24d   : > { %v818_v58 = vmax.f32 %v792_v52, 0.0  ;;  %v775_v9 = vadd.f32 %v774_v19, %v645_v0  ;;  %v833_v19 = vld [vmem:[%s1454_s5] sm:$0x1] }
 0x24f   : > { %v829_v2 = vpack.c.bf16 %v818_v58, %v817_v62 }
 0x252   : > { %v794_v20 = vpop.f32.mrf.mxu3 }
 0x253   : > { %v795_v50 = vadd.f32 %v794_v20, %v685_v26  ;;  %v811_v20 = vmax.f32 %v775_v9, 0.0 }
 0x254   : > { %v776_v24 = vpop.f32.mrf.mxu1 }
 0x255   : > { %v819_v57 = vmax.f32 %v795_v50, 0.0  ;;  %v777_v6 = vadd.f32 %v776_v24, %v650_v61 }
 0x257   : > { %v812_v14 = vmax.f32 %v777_v6, 0.0 }
 0x25a   : > { %v796_v23 = vpop.f32.mrf.mxu3 }
 0x25b   : > { %v797_v45 = vadd.f32 %v796_v23, %v690_v25 }
 0x25c   : > { %v779_v28 = vpop.f32.mrf.mxu1 }
 0x25d   : > { %v820_v53 = vmax.f32 %v797_v45, 0.0  ;;  %v780_v3 = vadd.f32 %v779_v28, %v655_v48 }
 0x25f   : > { %v830_v60 = vpack.c.bf16 %v820_v53, %v819_v57  ;;  %v813_v10 = vmax.f32 %v780_v3, 0.0 }
 0x262   : > { %v799_v27 = vpop.f32.mrf.mxu3 }
 0x263   : > { %v800_v41 = vadd.f32 %v799_v27, %v695_v22  ;;  %v826_v22 = vpack.c.bf16 %v812_v14, %v811_v20 }
 0x264   : > { %v781_v32 = vpop.f32.mrf.mxu1 }
 0x265   : > { %v821_v51 = vmax.f32 %v800_v41, 0.0  ;;  %v782_v1 = vadd.f32 %v781_v32, %v660_v44 }
 0x267   : > { %v814_v7 = vmax.f32 %v782_v1, 0.0 }
 0x269   : > { %v827_v16 = vpack.c.bf16 %v814_v7, %v813_v10 }
 0x26a   : > { %v801_v30 = vpop.f32.mrf.mxu3 }
 0x26b   : > { %v802_v39 = vadd.f32 %v801_v30, %v700_v21  ;;  %v810_v21 = vmax.f32 %v772_v12, 0.0 }
 0x26c   : > { %v784_v37 = vpop.f32.mrf.mxu1 }
 0x26d   : > { %v822_v46 = vmax.f32 %v802_v39, 0.0  ;;  %v785_v63 = vadd.f32 %v784_v37, %v665_v35 }
 0x26f   : > { %v831_v54 = vpack.c.bf16 %v822_v46, %v821_v51  ;;  %v815_v5 = vmax.f32 %v785_v63, 0.0 }
 0x272   : > { %v804_v33 = vpop.f32.mrf.mxu3 }
 0x273   : > { %v805_v36 = vadd.f32 %v804_v33, %v705_v18 }
 0x274   : > { %v786_v55 = vpop.f32.mrf.mxu1 }
 0x275   : > { %v823_v42 = vmax.f32 %v805_v36, 0.0  ;;  %v787_v59 = vadd.f32 %v786_v55, %v670_v34 }
 0x277   : > { %v816_v4 = vmax.f32 %v787_v59, 0.0 }
 0x279   : > { %v828_v8 = vpack.c.bf16 %v816_v4, %v815_v5 }
 0x27a   : > { %v806_v38 = vpop.f32.mrf.mxu3 }
 0x27b   : > { %v807_v40 = vadd.f32 %v806_v38, %v710_v17  ;;  %v635_v17 = vpop.permute.xlu1 %634 }
 0x27c   : > { %v770_v18 = vadd.f32 %v1408_v13, %v635_v17  ;;  %v840_v13 = vperm.slane %v838_v15, 0 }
 0x27d   : > { %v824_v43 = vmax.f32 %v807_v40, 0.0 }
 0x27e   : > { %v809_v23 = vmax.f32 %v770_v18, 0.0 }
 0x27f   : > { %v832_v47 = vpack.c.bf16 %v824_v43, %v823_v42 }
 0x280   : > { %v825_v24 = vpack.c.bf16 %v810_v21, %v809_v23 }
 0x281   : > { %841 = vmatpush.bf16.msrb.mxu2 %v832_v47 }
 0x285   : > { %842 = vmatpush.bf16.msrb.mxu2 %v831_v54 }
 0x289   : > { %843 = vmatpush.bf16.msrb.mxu2 %v830_v60 }
 0x28d   : > { %844 = vmatpush.bf16.msrb.mxu2 %v829_v2 }
 0x291   : > { %845 = vmatpush.bf16.msrb.mxu2 %v828_v8 }
 0x295   : > { %846 = vmatpush.bf16.msrb.mxu2 %v827_v16 }
 0x299   : > { %847 = vmatpush.bf16.msrb.mxu2 %v826_v22 }
 0x29d   : > { %848 = vmatpush.bf16.msrb.mxu2 %v825_v24 }
 0x2a0   : > { %849 = vmatmul.bf16.vlgmr.msrb.gmra.mxu2 %v833_v19 }
 0x323   : > { %v850_v25 = vpop.f32.mrf.mxu2 }
 0x324   : > { %v851_v26 = vadd.f32 %v850_v25, %v840_v13 }
 0x326   : > { %854 = vst [vmem:[%s285_s16] sm:$0x1] %v851_v26 }
 0x327   : > { %1098 = shalt.err (!%p1095_p3)
}
 0x328   : > { %1028 = dma.vmem_to_hbm [thread:$0]  (%p1217_p5), %s867_s17, 16, %s869_s19, %s856_s20  }
 0x32b   : > { %v852_v27 = vpop.f32.mrf.mxu2 }
 0x32c PF: > { %p1034_p4 = scmp.ge.s32.totalorder %s1133_s29, 2  ;;  %s880_s18 = sand.u32 1, %s1121_s26  }
 0x32d   : > { %s881_s9 = scalar_lea.sflag [#allocation4], %s880_s18 }
 0x32e   : > { %p1031_p7 = pnand %p1034_p4, %p1221_p6 }
 0x330   : > { %p1032_p8 = pneg %p1031_p7 }
 0x332   : > { %1116 = dma.done.wait (%p1032_p8), %s881_s9, 16  }
 0x333   : > { %1118 = vsyncadd (%p1032_p8), %s881_s9, 4294967280  ;;  %p19_p9 = scmp.ge.s32.totalorder %s1204_s8, 4   ;;  %s1459_s26 = smov %s1125_s27 }
 0x334   : > { %s1460_s27 = smov %s1129_s28  ;;  %s1461_s28 = smov %s1215_s11 }
 0x335   : > { %s1462_s29 = smov %s1204_s8  ;;  %21 = sbr.rel (!%p19_p9) target bundleno = 6 (0x6), region = 83 }
 0x33a   :  { %886 = vsyncpa [#allocation4], 1 }
 0x33b   :  { %888 = vsyncpa [#allocation4 + $0x1], 1 }

</bundles_post_ra>
